<compile_context>
chip_gen: v5e
topology: v5e:2x2
jax: 0.10.0
libtpu: 0.0.40
codegen_flags: <defaults>
</compile_context>

<pallas_src>
import jax
import jax.numpy as jnp
from jax.experimental import pallas as pl
from jax.experimental.pallas import tpu as pltpu


def attention_head_kernel(x_ref, wt_ref, bw_ref, v_ref, out_ref):
    TB, S, F = x_ref.shape

    x = x_ref[...]                                              # (TB, S, F) f32

    # --- att = tanh(x @ W^T + b_W): one big MXU matmul over TB*S rows,
    #     bf16 inputs, f32 accumulation.
    x2 = x.reshape(TB * S, F).astype(jnp.bfloat16)
    att = jnp.tanh(
        jnp.dot(x2, wt_ref[...], preferred_element_type=jnp.float32)
        + bw_ref[...]                                           # (1, H) bcast
    )                                                           # (TB*S, H) f32

    # --- score = att @ V^T with T == 1: VPU multiply + lane reduce instead of
    #     an N=1 MXU matmul.  (V bias dropped: cancelled by the softmax shift.)
    score = jnp.sum(att * v_ref[...], axis=-1, keepdims=True)   # (TB*S, 1)
    score = score.reshape(TB, S, 1)

    # --- softmax over the sequence axis, per batch element (full S resident).
    m = jnp.max(score, axis=1, keepdims=True)                   # (TB, 1, 1)
    e = jnp.exp(score - m)                                      # (TB, S, 1)
    denom = jnp.sum(e, axis=1, keepdims=True)                   # (TB, 1, 1)
    aw = e * pl.reciprocal(denom, approx=True)                  # (TB, S, 1)

    # --- context = sum_s aw * x  ->  lane/sublane-dense (TB, F) output slab.
    ctx = jnp.sum(aw * x.astype(jnp.float32), axis=1)           # (TB, F)
    out_ref[...] = ctx.astype(out_ref.dtype)


def _vmem_limit_bytes():
    """Scoped VMEM budget: ~80% of physical, capped at 100 MiB.

    64 MiB parts (v7x) -> ~51 MiB; 128 MiB parts (v5e/v6e) -> 100 MiB.
    Falls back to the conservative 64 MiB assumption if the query fails.
    """
    cap = 64 << 20
    try:
        info = pltpu.get_tpu_info()
        cap = int(getattr(info, "vmem_capacity_bytes", cap))
    except Exception:
        pass
    return max(32 << 20, min(int(cap * 0.8), 100 << 20))


def _pick_batch_tile(B, S, F, H, itemsize, vmem_limit):
    """Batch elements per grid step, sized by bytes of the features block.

    Constraints (in priority order):
      * features block + double buffer + in-kernel intermediates fit VMEM,
      * features block is multi-MiB (DMA efficiency plateaus ~4-8 MiB+),
      * tb is a multiple of 8 whenever the grid has more than one step
        (sublane-dense (tb, F) output stores),
      * at least 2-4 grid steps when B permits (megacore sharding on v7x),
      * prefer a tb that divides B (avoid a full jnp.pad copy of features).
    """
    row_bytes = S * F * itemsize

    # Per-step VMEM accounting:
    #   2x features block (double buffer) + ~0.5x (bf16 copy of x)
    #   + (H/F)x (f32 att slab) + output block/misc + resident weights + slack.
    fixed = F * H * 2 + (2 << 20)
    factor = 2.0 + 0.5 + (H / float(F)) + 0.25
    block_cap = max(row_bytes, int(max(vmem_limit - fixed, 1 << 20) / factor))
    # DMA-efficiency target: keep <= ~10 MiB on 64 MiB parts, ~24 MiB otherwise.
    target = (10 << 20) if vmem_limit <= (56 << 20) else (24 << 20)
    block_cap = min(block_cap, target)

    tb_max = max(1, block_cap // row_bytes)

    # Keep >=4 (>=2) grid steps when the batch allows it, so ("parallel",)
    # shards across both v7x TensorCores and the pipeline has depth.
    if B >= 32:
        tb_max = min(tb_max, B // 4)
    elif B >= 16:
        tb_max = min(tb_max, B // 2)

    if tb_max >= B:
        return B                       # single full block (grid == 1)

    # Grid has >1 step -> tb must be a multiple of 8 for a sublane-dense
    # (tb, F) output block.
    tb_max = max(8, (tb_max // 8) * 8)
    # TODO(synk): if even tb=8 overflows VMEM for huge S*F, tile over S with a
    # two-pass / online softmax instead of shrinking tb below 8.

    # Prefer the largest multiple-of-8 tile (within 2x of tb_max) that divides
    # B, so padding (a full extra HBM pass over features) is avoided.
    tb = tb_max
    while tb >= 8 and tb >= tb_max // 2:
        if B % tb == 0:
            return tb
        tb -= 8
    return tb_max


def attention_head(features, W_w, W_b, V_w, V_b, *, batch_tile=None):
    """features: [B, S, F]; W_w: [H, F]; W_b: [H]; V_w: [T, H]; V_b: [T]."""
    B, S, F = features.shape
    H = W_w.shape[0]
    T = V_w.shape[0]
    # TODO(synk): general T>1 needs an explicit 'bst,bsf->btf' contraction; the
    # PyTorch forward itself only broadcasts cleanly for T == 1.
    assert T == 1, "AttentionHead Pallas kernel supports num_targets == 1 only"

    vmem_limit = _vmem_limit_bytes()
    tb = batch_tile or _pick_batch_tile(
        B, S, F, H, jnp.dtype(features.dtype).itemsize, vmem_limit)

    Bp = -(-B // tb) * tb
    x = features
    if Bp != B:
        # Last-resort pad (one extra HBM pass over features); the tile picker
        # tries hard to choose a divisor of B first.  Padded rows produce
        # finite junk that is sliced off below.
        x = jnp.pad(x, ((0, Bp - B), (0, 0), (0, 0)))

    wt = jnp.asarray(W_w).T.astype(jnp.bfloat16)               # (F, H) bf16 MXU input
    bw = jnp.asarray(W_b).reshape(1, H).astype(jnp.float32)    # (1, H)
    vr = jnp.asarray(V_w).reshape(1, H).astype(jnp.float32)    # (1, H), T == 1
    del V_b  # mathematically a no-op under softmax over the sequence axis

    out = pl.pallas_call(
        attention_head_kernel,
        out_shape=jax.ShapeDtypeStruct((Bp, F), features.dtype),
        grid=(Bp // tb,),
        in_specs=[
            pl.BlockSpec((tb, S, F), lambda b: (b, 0, 0)),     # features slab
            pl.BlockSpec((F, H), lambda b: (0, 0)),            # W^T (resident)
            pl.BlockSpec((1, H), lambda b: (0, 0)),            # b_W
            pl.BlockSpec((1, H), lambda b: (0, 0)),            # V row
        ],
        out_specs=pl.BlockSpec((tb, F), lambda b: (b, 0)),
        compiler_params=pltpu.CompilerParams(
            dimension_semantics=("parallel",),
            vmem_limit_bytes=int(vmem_limit),
        ),
    )(x, wt, bw, vr)
    return out[:B]


def attention_head_ref(features, W_w, W_b, V_w, V_b):
    att = jnp.tanh(jnp.einsum("bsf,hf->bsh", features, W_w) + W_b)
    score = jnp.einsum("bsh,th->bst", att, V_w) + V_b
    aw = jax.nn.softmax(score, axis=1)
    return jnp.sum(aw * features, axis=1)


if __name__ == "__main__":
    key = jax.random.PRNGKey(0)

    def run_case(B, S, F, H, T=1):
        ks = jax.random.split(jax.random.fold_in(key, B * 1000 + S), 5)
        features = jax.random.normal(ks[0], (B, S, F), dtype=jnp.float32)
        # PyTorch nn.Linear stores weight as [out, in]
        W_w = jax.random.normal(ks[1], (H, F), dtype=jnp.float32) * 0.1
        W_b = jax.random.normal(ks[2], (H,), dtype=jnp.float32) * 0.1
        V_w = jax.random.normal(ks[3], (T, H), dtype=jnp.float32) * 0.1
        V_b = jax.random.normal(ks[4], (T,), dtype=jnp.float32) * 0.1

        out = jax.block_until_ready(attention_head(features, W_w, W_b, V_w, V_b))
        ref = attention_head_ref(features, W_w, W_b, V_w, V_b)
        assert out.shape == (B, F)
        # bf16 MXU inputs + approx reciprocal -> compare at bf16-level tolerance
        err = float(jnp.max(jnp.abs(out - ref)))
        assert jnp.allclose(out, ref, atol=1e-2, rtol=1e-2), (
            f"mismatch vs reference: max abs err {err:.3e}")

    # small shape consistent with the module (batch, seq, in_features, hidden)
    run_case(2, 8, 32, 32, 1)
    # single full block, tb == B (no padding, grid == 1)
    run_case(10, 128, 128, 64, 1)
    # multi-step grid with tb a multiple of 8 that divides B (no padding)
    run_case(48, 128, 256, 64, 1)
    # exercises the last-resort padding path (B=20 -> tb=8, pad to 24, grid=3)
    run_case(20, 64, 128, 32, 1)

    print("KERNEL_OK")
</pallas_src>

<mosaic_0001>
module attributes {stable_mosaic.version = 11 : i64} {
  func.func @attention_head_kernel(%arg0: i32, %arg1: memref<2x8x32xf32, #tpu.memory_space<vmem>>, %arg2: memref<32x32xbf16, #tpu.memory_space<vmem>>, %arg3: memref<1x32xf32, #tpu.memory_space<vmem>>, %arg4: memref<1x32xf32, #tpu.memory_space<vmem>>, %arg5: memref<2x32xf32, #tpu.memory_space<vmem>>) attributes {dimension_semantics = [#tpu.dimension_semantics<parallel>], iteration_bounds = array<i64: 1>, scalar_prefetch = 0 : i64, scratch_operands = 0 : i64, tpu.core_type = #tpu.core_type<tc>, window_params = [{transform_indices = @transform_0, window_bounds = array<i64: 2, 8, 32>}, {pipeline_mode = #tpu.pipeline_mode<synchronous>, transform_indices = @transform_1, window_bounds = array<i64: 32, 32>}, {pipeline_mode = #tpu.pipeline_mode<synchronous>, transform_indices = @transform_2, window_bounds = array<i64: 1, 32>}, {pipeline_mode = #tpu.pipeline_mode<synchronous>, transform_indices = @transform_3, window_bounds = array<i64: 1, 32>}, {transform_indices = @transform_4, window_bounds = array<i64: 2, 32>}]} {
    %c0 = arith.constant 0 : index
    %c0_0 = arith.constant 0 : index
    %c0_1 = arith.constant 0 : index
    %0 = vector.load %arg1[%c0, %c0_0, %c0_1] : memref<2x8x32xf32, #tpu.memory_space<vmem>>, vector<2x8x32xf32>
    %1 = vector.shape_cast %0 : vector<2x8x32xf32> to vector<16x32xf32>
    %2 = arith.truncf %1 : vector<16x32xf32> to vector<16x32xbf16>
    %c0_2 = arith.constant 0 : index
    %c0_3 = arith.constant 0 : index
    %3 = vector.load %arg2[%c0_2, %c0_3] : memref<32x32xbf16, #tpu.memory_space<vmem>>, vector<32x32xbf16>
    %cst = arith.constant dense<0.000000e+00> : vector<16x32xf32>
    %4 = tpu.matmul %2, %3, %cst {dimension_numbers = #tpu.dot_dimension_numbers<[1], [0], [0], [1], [0, 0, 1, 1], [], []>} : vector<16x32xbf16>, vector<32x32xbf16>, vector<16x32xf32> -> vector<16x32xf32>
    %c0_4 = arith.constant 0 : index
    %c0_5 = arith.constant 0 : index
    %5 = vector.load %arg3[%c0_4, %c0_5] : memref<1x32xf32, #tpu.memory_space<vmem>>, vector<1x32xf32>
    %6 = vector.broadcast %5 : vector<1x32xf32> to vector<16x32xf32>
    %7 = arith.addf %4, %6 : vector<16x32xf32>
    %8 = math.tanh %7 : vector<16x32xf32>
    %c0_6 = arith.constant 0 : index
    %c0_7 = arith.constant 0 : index
    %9 = vector.load %arg4[%c0_6, %c0_7] : memref<1x32xf32, #tpu.memory_space<vmem>>, vector<1x32xf32>
    %10 = vector.broadcast %9 : vector<1x32xf32> to vector<16x32xf32>
    %11 = arith.mulf %8, %10 : vector<16x32xf32>
    %cst_8 = arith.constant dense<0.000000e+00> : vector<16xf32>
    %12 = vector.multi_reduction <add>, %11, %cst_8 [1] : vector<16x32xf32> to vector<16xf32>
    %13 = vector.shape_cast %12 : vector<16xf32> to vector<16x1xf32>
    %14 = vector.shape_cast %13 : vector<16x1xf32> to vector<2x8x1xf32>
    %cst_9 = arith.constant dense<0xFF800000> : vector<2x1xf32>
    %15 = vector.multi_reduction <maximumf>, %14, %cst_9 [1] : vector<2x8x1xf32> to vector<2x1xf32>
    %16 = vector.shape_cast %15 : vector<2x1xf32> to vector<2x1x1xf32>
    %17 = vector.broadcast %16 : vector<2x1x1xf32> to vector<2x8x1xf32>
    %18 = arith.subf %14, %17 : vector<2x8x1xf32>
    %19 = math.exp %18 : vector<2x8x1xf32>
    %cst_10 = arith.constant dense<0.000000e+00> : vector<2x1xf32>
    %20 = vector.multi_reduction <add>, %19, %cst_10 [1] : vector<2x8x1xf32> to vector<2x1xf32>
    %21 = vector.shape_cast %20 : vector<2x1xf32> to vector<2x1x1xf32>
    %22 = tpu.reciprocal %21 {approx = true} : vector<2x1x1xf32> -> vector<2x1x1xf32>
    %23 = vector.broadcast %22 : vector<2x1x1xf32> to vector<2x8x1xf32>
    %24 = arith.mulf %19, %23 : vector<2x8x1xf32>
    %25 = vector.broadcast %24 : vector<2x8x1xf32> to vector<2x8x32xf32>
    %26 = arith.mulf %25, %0 : vector<2x8x32xf32>
    %cst_11 = arith.constant dense<0.000000e+00> : vector<2x32xf32>
    %27 = vector.multi_reduction <add>, %26, %cst_11 [1] : vector<2x8x32xf32> to vector<2x32xf32>
    %c0_12 = arith.constant 0 : index
    %c0_13 = arith.constant 0 : index
    %28 = vector.load %arg5[%c0_12, %c0_13] : memref<2x32xf32, #tpu.memory_space<vmem>>, vector<2x32xf32>
    tpu.vector_store %arg5[%c0_12, %c0_13], %27 {strides = array<i32>} : memref<2x32xf32, #tpu.memory_space<vmem>>, vector<2x32xf32>,
    return
  }
  func.func @transform_0(%arg0: i32) -> (i32, i32, i32) {
    %c0_i32 = arith.constant 0 : i32
    %c0_i32_0 = arith.constant 0 : i32
    %c0_i32_1 = arith.constant 0 : i32
    return %arg0, %c0_i32, %c0_i32_0 : i32, i32, i32
  }
  func.func @transform_1(%arg0: i32) -> (i32, i32) {
    %c0_i32 = arith.constant 0 : i32
    %c0_i32_0 = arith.constant 0 : i32
    %c0_i32_1 = arith.constant 0 : i32
    return %c0_i32, %c0_i32_0 : i32, i32
  }
  func.func @transform_2(%arg0: i32) -> (i32, i32) {
    %c0_i32 = arith.constant 0 : i32
    %c0_i32_0 = arith.constant 0 : i32
    %c0_i32_1 = arith.constant 0 : i32
    return %c0_i32, %c0_i32_0 : i32, i32
  }
  func.func @transform_3(%arg0: i32) -> (i32, i32) {
    %c0_i32 = arith.constant 0 : i32
    %c0_i32_0 = arith.constant 0 : i32
    %c0_i32_1 = arith.constant 0 : i32
    return %c0_i32, %c0_i32_0 : i32, i32
  }
  func.func @transform_4(%arg0: i32) -> (i32, i32) {
    %c0_i32 = arith.constant 0 : i32
    %c0_i32_0 = arith.constant 0 : i32
    return %arg0, %c0_i32 : i32, i32
  }
}

</mosaic_0001>

<bundles_post_ra>
// kernel: tpu_custom_call.1
= control target key start
LH: loop header
LB: loop body
LE: loop exit
PB: predicated region body
PF: predicated region fallthrough
CT: control target
= control target key end

     0   :  { %9 = vsyncpa [#allocation3], 0  ;;  %s347_s0 = inlined_call_operand.hbm [shape: f32[2,8,32], index: 0, kind: input, shape index: {}]   ;;  %s348_s1 = inlined_call_operand.hbm [shape: bf16[32,32], index: 1, kind: input, shape index: {}]   ;;  %s349_s2 = inlined_call_operand.vmem [shape: f32[1,32], index: 2, kind: input, shape index: {}]   ;;  %s350_s3 = inlined_call_operand.vmem [shape: f32[1,32], index: 3, kind: input, shape index: {}]   ;;  %s351_s4 = inlined_call_operand.hbm [shape: f32[2,32], index: 4, kind: output, shape index: {}]  }
   0x1   :  { %10 = vsyncpa [#allocation6], 0 }
   0x2   :  { %11 = vsyncpa [#allocation4], 0  ;;  %s16_s17 = sshll.u32 %s347_s0, 4  ;;  %s291_s18 = smov [#allocation2]   ;;  %s17_s17 = int_to_ptr.hbm [resolvable:$true] %s16_s17 }
   0x3   :  { %s18_s19 = sshll.u32 %s291_s18, 4  ;;  %s29_s22 = sshll.u32 %s348_s1, 4  ;;  %s19_s19 = int_to_ptr.vmem [resolvable:$true] %s18_s19  ;;  %s30_s22 = int_to_ptr.hbm [resolvable:$true] %s29_s22 }
   0x4   :  { %s292_s23 = smov 128   ;;  %s293_s24 = smov 8  }
   0x5   :  { %24 = dma.hbm_to_vmem [thread:$0]  %s17_s17, 256, %s19_s19, [#allocation3], %s292_s23, %s292_s23, %s293_s24  }
   0x6   :  { %s294_s25 = smov [#allocation5]   ;;  %s295_s27 = smov 64  }
   0x7   :  { %s31_s26 = sshll.u32 %s294_s25, 4  ;;  %s296_s28 = smov 4   ;;  %s32_s26 = int_to_ptr.vmem [resolvable:$true] %s31_s26 }
   0x8   :  { %37 = dma.hbm_to_vmem [thread:$0]  %s30_s22, 256, %s32_s26, [#allocation6], %s295_s27, %s295_s27, %s296_s28  }
   0x9   :  { %285 = dma.done.wait [#allocation3], 256  }
   0xa   :  { %286 = vsyncadd [#allocation3], 4294967040 }
   0xb   :  { %287 = dma.done.wait [#allocation6], 256  }
   0xc   :  { %288 = vsyncadd [#allocation6], 4294967040  ;;  %v191_v0 = vld [vmem:[#allocation5 + $0x8] sm:$0xff]  ;;  %v190_v1 = vld [vmem:[#allocation5] sm:$0xff]  ;;  %vm74_vm0 = vcmask 261120   ;;  %s170_s7 = sshll.u32 %s351_s4, 4  ;;  %s171_s7 = int_to_ptr.hbm [resolvable:$true] %s170_s7 }
   0xd   :  { %84 = vmatpush.bf16.msra.mxu0 %v191_v0  ;;  %v51_v2 = vld [vmem:[#allocation2] sm:$0xff]  ;;  %v329_v3 = vld [vmem:[#allocation2 + $0x8] sm:$0xff]  ;;  %vm158_vm1 = vcmask 1041409   ;;  %vm161_vm2 = vcmask 254976  }
   0xe   :  { %v53_v4 = vpack.c.bf16 %v329_v3, %v51_v2  ;;  %v199_v5 = vld [vmem:[%s349_s2] ss:$0 sm:$0xff]  ;;  %s297_s2 = smov [#allocation7]  }
   0xf   :  { %v200_v8 = vld [vmem:[%s350_s3] ss:$0 sm:$0xff]  ;;  %s168_s3 = sshll.u32 %s297_s2, 4  ;;  %s169_s3 = int_to_ptr.vmem [resolvable:$true] %s168_s3 }
  0x11   :  { %85 = vmatpush.bf16.msra.mxu0 %v190_v1 }
  0x14   :  { %189 = vmatmul.msk.bf16.vlgmr.msra.gmra.mxu0 %vm74_vm0, %v53_v4 }
  0x91   :  { %v87_v6 = vpop.f32.mrf.mxu0 }
  0x92   :  { %v88_v7 = vadd.f32 %v199_v5, %v87_v6 }
  0x94   :  { %201 = vtanh.f32 %v88_v7 }
  0x99   :  { %v89_v9 = vpop.f32.mrf.mxu0 }
  0x9a   :  { %v202_v10 = vpop.eup %201  ;;  %v90_v11 = vadd.f32 %v199_v5, %v89_v9 }
  0x9b   :  { %v98_v12 = vmul.f32 %v202_v10, %v200_v8 }
  0x9c   :  { %203 = vtanh.f32 %v90_v11 }
  0x9d   :  { %v100_v13 = vsel %vm74_vm0, %v98_v12, 0.0 }
  0x9e   :  { %101 = vadd.xlane.f32.xlu0 %v100_v13 }
  0xa2   :  { %v204_v14 = vpop.eup %203 }
  0xa3   :  { %v99_v15 = vmul.f32 %v204_v14, %v200_v8 }
  0xa5   :  { %v103_v16 = vsel %vm74_vm0, %v99_v15, 0.0 }
  0xa6   :  { %104 = vadd.xlane.f32.xlu0 %v103_v16 }
 0x111   :  { %v102_v17 = vpop.xlane.xlu0 %101 }
 0x112   :  { %v106_v18 = vrot.slane %v102_v17, 4 }
 0x114   :  { %v107_v19 = vmax.f32 %v102_v17, %v106_v18 }
 0x116   :  { %v108_v20 = vrot.slane %v107_v19, 2 }
 0x118   :  { %v109_v21 = vmax.f32 %v107_v19, %v108_v20 }
 0x119   :  { %v105_v22 = vpop.xlane.xlu0 %104 }
 0x11a   :  { %v110_v23 = vrot.slane %v109_v21, 1  ;;  %v112_v24 = vrot.slane %v105_v22, 4 }
 0x11c   :  { %v111_v25 = vmax.f32 %v109_v21, %v110_v23  ;;  %v113_v26 = vmax.f32 %v105_v22, %v112_v24 }
 0x11e   :  { %v118_v27 = vsub.f32 %v102_v17, %v111_v25  ;;  %v114_v28 = vrot.slane %v113_v26, 2 }
 0x120   :  { %v120_v29 = vmul.f32 1.442695, %v118_v27  ;;  %v115_v30 = vmax.f32 %v113_v26, %v114_v28 }
 0x122   :  { %205 = vpow2.f32 %v120_v29  ;;  %v116_v31 = vrot.slane %v115_v30, 1 }
 0x124   :  { %v117_v32 = vmax.f32 %v115_v30, %v116_v31 }
 0x126   :  { %v119_v33 = vsub.f32 %v105_v22, %v117_v32 }
 0x128   :  { %v206_v34 = vpop.eup %205  ;;  %v122_v35 = vmul.f32 1.442695, %v119_v33 }
 0x129   :  { %v124_v36 = vrot.slane %v206_v34, 4 }
 0x12a   :  { %207 = vpow2.f32 %v122_v35 }
 0x12b   :  { %v125_v37 = vadd.f32 %v206_v34, %v124_v36 }
 0x12d   :  { %v126_v38 = vrot.slane %v125_v37, 2 }
 0x12f   :  { %v127_v39 = vadd.f32 %v126_v38, %v125_v37 }
 0x130   :  { %v208_v40 = vpop.eup %207 }
 0x131   :  { %v128_v41 = vrot.slane %v127_v39, 1  ;;  %v130_v42 = vrot.slane %v208_v40, 4 }
 0x133   :  { %v129_v43 = vadd.f32 %v128_v41, %v127_v39  ;;  %v131_v44 = vadd.f32 %v208_v40, %v130_v42 }
 0x135   :  { %209 = vrcp.f32 %v129_v43  ;;  %v132_v45 = vrot.slane %v131_v44, 2 }
 0x137   :  { %v133_v46 = vadd.f32 %v132_v45, %v131_v44 }
 0x139   :  { %v134_v47 = vrot.slane %v133_v46, 1 }
 0x13b   :  { %v210_v48 = vpop.eup %209  ;;  %v135_v49 = vadd.f32 %v134_v47, %v133_v46 }
 0x13c   :  { %v138_v50 = vmul.f32 %v210_v48, %v206_v34 }
 0x13d   :  { %211 = vrcp.f32 %v135_v49 }
 0x13e   :  { %v140_v51 = vmul.f32 %v138_v50, %v51_v2 }
 0x140   :  { %v142_v52 = vsel %vm74_vm0, %v140_v51, 0.0 }
 0x141   :  { %v143_v53 = vrot.slane %v142_v52, 4 }
 0x143   :  { %v212_v54 = vpop.eup %211  ;;  %v144_v55 = vadd.f32 %v143_v53, %v142_v52 }
 0x144   :  { %v139_v56 = vmul.f32 %v212_v54, %v208_v40 }
 0x145   :  { %v145_v58 = vrot.slane %v144_v55, 2 }
 0x146   :  { %v141_v57 = vmul.f32 %v139_v56, %v329_v3 }
 0x147   :  { %v146_v61 = vadd.f32 %v145_v58, %v144_v55 }
 0x148   :  { %v149_v59 = vsel %vm74_vm0, %v141_v57, 0.0 }
 0x149   :  { %v150_v60 = vrot.slane %v149_v59, 4  ;;  %v147_v0 = vrot.slane %v146_v61, 1 }
 0x14b   :  { %v151_v62 = vadd.f32 %v150_v60, %v149_v59  ;;  %v148_v2 = vadd.f32 %v147_v0, %v146_v61 }
 0x14d   :  { %v152_v63 = vrot.slane %v151_v62, 2 }
 0x14f   :  { %v153_v1 = vadd.f32 %v152_v63, %v151_v62 }
 0x151   :  { %v154_v4 = vrot.slane %v153_v1, 1 }
 0x153   :  { %v155_v5 = vadd.f32 %v154_v4, %v153_v1 }
 0x155   :  { %v159_v3 = vsel %vm158_vm1, %v155_v5, %v148_v2 }
 0x156   :  { %162 = vst.msk [vmem:[#allocation7] sm:$0x3] %vm161_vm2, %v159_v3 }
 0x157   :  { %173 = dma.vmem_to_hbm [thread:$0]  %s169_s3, 32, %s171_s7, [#allocation4]  }
 0x158   :  { %289 = dma.done.wait [#allocation4], 32  }
 0x159   :  { %290 = vsyncadd [#allocation4], 4294967264 }
 0x15a   :  { %178 = vsyncpa [#allocation3], 1 }
 0x15b   :  { %179 = vsyncpa [#allocation6], 1 }
 0x15c   :  { %180 = vsyncpa [#allocation4], 1 }

</bundles_post_ra>
